<compile_context>
chip_gen: v5e
topology: v5e:2x2
jax: 0.10.0
libtpu: 0.0.40
codegen_flags: <defaults>
</compile_context>

<pallas_src>
import jax
import jax.numpy as jnp
from jax.experimental import pallas as pl
from jax.experimental.pallas import tpu as pltpu

LANE = 128          # lane width (last-dim alignment)
SUBLANE = 8         # f32 sublane pack
BF16_SUBLANE = 16   # bf16 sublane pack


def _round_up(n, m):
    return ((n + m - 1) // m) * m


# ----------------------------- Pallas kernel ------------------------------ #
def gnn_kernel(a_ref, at_ref, x_ref, p_ref, w1_ref, b1_ref, w2_ref, o_ref):
    """One row-tile of N: partial = ((P @ A[:, tile]) @ H1[tile]) @ W2."""
    f32, bf16 = jnp.float32, jnp.bfloat16

    # Layer 1, reordered: H1_tile = relu((A_row_strip @ X) @ W1 + b1).
    # bf16 operands into the MXU, f32 accumulation; bias + ReLU epilogue in f32.
    ax = jnp.dot(a_ref[...], x_ref[...], preferred_element_type=f32)          # (tm, Cin)
    h1 = jnp.dot(ax.astype(bf16), w1_ref[...], preferred_element_type=f32)    # (tm, Chid)
    h1 = jnp.maximum(h1 + b1_ref[0:1, :], 0.0).astype(bf16)

    # Pool-reassociated layer 2: PA_cols[g, r] = sum_k P[g, k] * A_hat[k, tile_r].
    # A_hat^T row strip == A_hat column strip; contract over the last dims
    # (q @ k^T style matmul -> well supported MXU pattern).
    pa = jax.lax.dot_general(
        p_ref[...], at_ref[...],
        dimension_numbers=(((1,), (1,)), ((), ())),
        preferred_element_type=f32)                                           # (G, tm)

    s = jnp.dot(pa.astype(bf16), h1, preferred_element_type=f32)              # (G, Chid)
    o_ref[...] = jnp.dot(s.astype(bf16), w2_ref[...],
                         preferred_element_type=f32)                          # (G, Cout)


def gnn_forward_pallas(a_hat, x, w1, b1, w2, b2, p_onehot, inv_counts):
    n = a_hat.shape[0]
    cin, chid = w1.shape
    cout = w2.shape[1]
    g = p_onehot.shape[0]

    # Row tile over N: 128 is plenty at toy size / v5e; grows to 256 multiples
    # for the bigger v6e/v7x MXU once N is large.
    tm = 128 if n <= 128 else 256
    n_p = _round_up(n, tm)
    n_tiles = n_p // tm
    cin_p = _round_up(cin, LANE)
    chid_p = _round_up(chid, LANE)
    cout_p = _round_up(cout, LANE)
    g_p = _round_up(g, BF16_SUBLANE)     # bf16 pool rows -> 16-sublane pack

    def pad2(arr, rows, cols):
        return jnp.pad(arr, ((0, rows - arr.shape[0]), (0, cols - arr.shape[1])))

    bf16 = jnp.bfloat16
    a_p = pad2(a_hat, n_p, n_p).astype(bf16)
    # Column strips of A_hat as row strips of A_hat^T (== a_p when the graph is
    # undirected and A_hat is symmetric; kept explicit for full generality).
    at_p = pad2(a_hat.T, n_p, n_p).astype(bf16)
    x_p = pad2(x, n_p, cin_p).astype(bf16)
    p_p = pad2(p_onehot, g_p, n_p).astype(bf16)            # exact 0/1 in bf16
    w1_p = pad2(w1, cin_p, chid_p).astype(bf16)
    w2_p = pad2(w2, chid_p, cout_p).astype(bf16)
    b1_p = pad2(jnp.broadcast_to(b1.reshape(1, -1), (SUBLANE, chid)),
                SUBLANE, chid_p).astype(jnp.float32)

    flops = 2 * (n_p * n_p * cin_p                     # A @ X
                 + n_p * cin_p * chid_p                # (A X) @ W1
                 + g_p * n_p * n_p                     # P @ A
                 + g_p * n_p * chid_p                  # (P A) @ H1
                 + n_tiles * g_p * chid_p * cout_p)    # @ W2 per tile
    bytes_accessed = int(
        (a_p.size + at_p.size + x_p.size + p_p.size + w1_p.size + w2_p.size) * 2
        + b1_p.size * 4 + n_tiles * g_p * cout_p * 4)

    partials = pl.pallas_call(
        gnn_kernel,
        out_shape=jax.ShapeDtypeStruct((n_tiles, g_p, cout_p), jnp.float32),
        grid=(n_tiles,),
        in_specs=[
            pl.BlockSpec((tm, n_p), lambda i: (i, 0)),          # A_hat row strip
            pl.BlockSpec((tm, n_p), lambda i: (i, 0)),          # A_hat^T row strip
            pl.BlockSpec((n_p, cin_p), lambda i: (0, 0)),       # X      (resident)
            pl.BlockSpec((g_p, n_p), lambda i: (0, 0)),         # P 0/1  (resident)
            pl.BlockSpec((cin_p, chid_p), lambda i: (0, 0)),    # W1     (resident)
            pl.BlockSpec((SUBLANE, chid_p), lambda i: (0, 0)),  # b1     (resident)
            pl.BlockSpec((chid_p, cout_p), lambda i: (0, 0)),   # W2     (resident)
        ],
        out_specs=pl.BlockSpec((None, g_p, cout_p), lambda i: (i, 0, 0)),
        compiler_params=pltpu.CompilerParams(
            dimension_semantics=("parallel",),
            vmem_limit_bytes=48 << 20),                         # v7x-safe (64 MiB/TC)
        cost_estimate=pl.CostEstimate(flops=flops, transcendentals=0,
                                      bytes_accessed=bytes_accessed),
    )(a_p, at_p, x_p, p_p, w1_p, b1_p, w2_p)

    # Tiny f32 epilogue: reduce per-tile partials, apply exact 1/count mean and bias.
    pooled = partials.sum(axis=0)[:g, :cout]
    return pooled * inv_counts[:, None] + b2.reshape(1, cout)


# ------------------------------ plain-JAX glue ----------------------------- #
def build_a_hat(edge_index, num_nodes):
    """Symmetric GCN normalization of A with remaining self-loops (PyG gcn_norm)."""
    src, tgt = edge_index[0], edge_index[1]
    adj = jnp.zeros((num_nodes, num_nodes), jnp.float32)
    adj = adj.at[tgt, src].add(1.0)                       # scatter-ADD (parallel edges)
    diag = jnp.diagonal(adj)
    adj = adj + jnp.diag(jnp.where(diag > 0, 0.0, 1.0))   # add_remaining_self_loops
    deg = adj.sum(axis=1)
    d_inv_sqrt = jnp.where(deg > 0, 1.0 / jnp.sqrt(jnp.maximum(deg, 1e-12)), 0.0)
    return d_inv_sqrt[:, None] * adj * d_inv_sqrt[None, :]


def build_mean_pool(batch, num_graphs):
    """Exact one-hot sum-pool matrix + f32 reciprocal counts (mean applied in f32)."""
    onehot = (batch[None, :] == jnp.arange(num_graphs)[:, None]).astype(jnp.float32)
    counts = onehot.sum(axis=1)
    inv_counts = jnp.where(counts > 0, 1.0 / jnp.maximum(counts, 1.0), 0.0)
    return onehot, inv_counts


def reference_forward(a_hat, x, w1, b1, w2, b2, p_onehot, inv_counts):
    """Mirrors the kernel's reassociated bf16-in / f32-accumulate numeric path."""
    bf, f32 = jnp.bfloat16, jnp.float32

    def mm(a, b):
        return jnp.dot(a.astype(bf), b.astype(bf), preferred_element_type=f32)

    ax = mm(a_hat, x)
    h1 = jnp.maximum(mm(ax, w1) + b1.reshape(1, -1), 0.0)
    pa = mm(p_onehot, a_hat)
    s = mm(pa, h1)
    pooled = mm(s, w2)
    return pooled * inv_counts[:, None] + b2.reshape(1, -1)


def reference_forward_f32(a_hat, x, w1, b1, w2, b2, p_onehot, inv_counts):
    """Pure-f32 reference matching the original torch module semantics."""
    h1 = jnp.maximum(a_hat @ x @ w1 + b1.reshape(1, -1), 0.0)
    h2 = a_hat @ h1 @ w2 + b2.reshape(1, -1)
    return (p_onehot @ h2) * inv_counts[:, None]


# --------------------------------- driver ---------------------------------- #
if __name__ == "__main__":
    num_nodes = 8
    in_channels = 4
    hidden_channels = 32
    out_channels = 8
    num_graphs = 2

    key = jax.random.PRNGKey(0)
    k_x, k_w1, k_b1, k_w2, k_b2 = jax.random.split(key, 5)

    x = jax.random.normal(k_x, (num_nodes, in_channels), jnp.float32)

    # Two graphs of 4 nodes each; bidirectional chain edges within each graph.
    batch = jnp.array([0, 0, 0, 0, 1, 1, 1, 1], jnp.int32)
    edge_index = jnp.array(
        [[0, 1, 1, 2, 2, 3, 4, 5, 5, 6, 6, 7],
         [1, 0, 2, 1, 3, 2, 5, 4, 6, 5, 7, 6]], jnp.int32)

    w1 = jax.random.normal(k_w1, (in_channels, hidden_channels), jnp.float32) * 0.1
    b1 = jax.random.normal(k_b1, (1, hidden_channels), jnp.float32) * 0.1
    w2 = jax.random.normal(k_w2, (hidden_channels, out_channels), jnp.float32) * 0.1
    b2 = jax.random.normal(k_b2, (1, out_channels), jnp.float32) * 0.1

    a_hat = build_a_hat(edge_index, num_nodes)
    p_onehot, inv_counts = build_mean_pool(batch, num_graphs)

    out = gnn_forward_pallas(a_hat, x, w1, b1, w2, b2, p_onehot, inv_counts)
    out = jax.block_until_ready(out)

    ref = reference_forward(a_hat, x, w1, b1, w2, b2, p_onehot, inv_counts)
    ref_f32 = reference_forward_f32(a_hat, x, w1, b1, w2, b2, p_onehot, inv_counts)

    assert out.shape == (num_graphs, out_channels)
    assert jnp.allclose(out, ref, atol=1e-2, rtol=1e-2), (
        f"max abs err vs bf16-mirrored ref: {jnp.max(jnp.abs(out - ref))}")
    assert jnp.allclose(out, ref_f32, atol=5e-2, rtol=5e-2), (
        f"max abs err vs f32 ref: {jnp.max(jnp.abs(out - ref_f32))}")

    print("KERNEL_OK")
</pallas_src>

<mosaic_0001>
module attributes {stable_mosaic.version = 11 : i64} {
  func.func @gnn_kernel(%arg0: i32, %arg1: memref<128x128xbf16, #tpu.memory_space<vmem>>, %arg2: memref<128x128xbf16, #tpu.memory_space<vmem>>, %arg3: memref<128x128xbf16, #tpu.memory_space<vmem>>, %arg4: memref<16x128xbf16, #tpu.memory_space<vmem>>, %arg5: memref<128x128xbf16, #tpu.memory_space<vmem>>, %arg6: memref<8x128xf32, #tpu.memory_space<vmem>>, %arg7: memref<128x128xbf16, #tpu.memory_space<vmem>>, %arg8: memref<1x16x128xf32, #tpu.memory_space<vmem>>) attributes {dimension_semantics = [#tpu.dimension_semantics<parallel>], iteration_bounds = array<i64: 1>, scalar_prefetch = 0 : i64, scratch_operands = 0 : i64, tpu.core_type = #tpu.core_type<tc>, window_params = [{transform_indices = @transform_0, window_bounds = array<i64: 128, 128>}, {transform_indices = @transform_1, window_bounds = array<i64: 128, 128>}, {pipeline_mode = #tpu.pipeline_mode<synchronous>, transform_indices = @transform_2, window_bounds = array<i64: 128, 128>}, {pipeline_mode = #tpu.pipeline_mode<synchronous>, transform_indices = @transform_3, window_bounds = array<i64: 16, 128>}, {pipeline_mode = #tpu.pipeline_mode<synchronous>, transform_indices = @transform_4, window_bounds = array<i64: 128, 128>}, {pipeline_mode = #tpu.pipeline_mode<synchronous>, transform_indices = @transform_5, window_bounds = array<i64: 8, 128>}, {pipeline_mode = #tpu.pipeline_mode<synchronous>, transform_indices = @transform_6, window_bounds = array<i64: 128, 128>}, {transform_indices = @transform_7, window_bounds = array<i64: 1, 16, 128>}]} {
    %c0 = arith.constant 0 : index
    %c0_0 = arith.constant 0 : index
    %0 = vector.load %arg1[%c0, %c0_0] : memref<128x128xbf16, #tpu.memory_space<vmem>>, vector<128x128xbf16>
    %c0_1 = arith.constant 0 : index
    %c0_2 = arith.constant 0 : index
    %1 = vector.load %arg3[%c0_1, %c0_2] : memref<128x128xbf16, #tpu.memory_space<vmem>>, vector<128x128xbf16>
    %cst = arith.constant dense<0.000000e+00> : vector<128x128xf32>
    %2 = tpu.matmul %0, %1, %cst {dimension_numbers = #tpu.dot_dimension_numbers<[1], [0], [0], [1], [0, 0, 1, 1], [], []>} : vector<128x128xbf16>, vector<128x128xbf16>, vector<128x128xf32> -> vector<128x128xf32>
    %3 = arith.truncf %2 : vector<128x128xf32> to vector<128x128xbf16>
    %c0_3 = arith.constant 0 : index
    %c0_4 = arith.constant 0 : index
    %4 = vector.load %arg5[%c0_3, %c0_4] : memref<128x128xbf16, #tpu.memory_space<vmem>>, vector<128x128xbf16>
    %cst_5 = arith.constant dense<0.000000e+00> : vector<128x128xf32>
    %5 = tpu.matmul %3, %4, %cst_5 {dimension_numbers = #tpu.dot_dimension_numbers<[1], [0], [0], [1], [0, 0, 1, 1], [], []>} : vector<128x128xbf16>, vector<128x128xbf16>, vector<128x128xf32> -> vector<128x128xf32>
    %c0_6 = arith.constant 0 : index
    %c0_7 = arith.constant 0 : index
    %6 = vector.load %arg6[%c0_6, %c0_7] : memref<8x128xf32, #tpu.memory_space<vmem>>, vector<1x128xf32>
    %7 = vector.broadcast %6 : vector<1x128xf32> to vector<128x128xf32>
    %8 = arith.addf %5, %7 : vector<128x128xf32>
    %cst_8 = arith.constant 0.000000e+00 : f32
    %9 = vector.broadcast %cst_8 : f32 to vector<128x128xf32>
    %10 = arith.maximumf %8, %9 : vector<128x128xf32>
    %11 = arith.truncf %10 : vector<128x128xf32> to vector<128x128xbf16>
    %c0_9 = arith.constant 0 : index
    %c0_10 = arith.constant 0 : index
    %12 = vector.load %arg4[%c0_9, %c0_10] : memref<16x128xbf16, #tpu.memory_space<vmem>>, vector<16x128xbf16>
    %c0_11 = arith.constant 0 : index
    %c0_12 = arith.constant 0 : index
    %13 = vector.load %arg2[%c0_11, %c0_12] : memref<128x128xbf16, #tpu.memory_space<vmem>>, vector<128x128xbf16>
    %cst_13 = arith.constant dense<0.000000e+00> : vector<16x128xf32>
    %14 = tpu.matmul %12, %13, %cst_13 {dimension_numbers = #tpu.dot_dimension_numbers<[1], [1], [0], [0], [0, 0, 1, 0], [], []>} : vector<16x128xbf16>, vector<128x128xbf16>, vector<16x128xf32> -> vector<16x128xf32>
    %15 = arith.truncf %14 : vector<16x128xf32> to vector<16x128xbf16>
    %cst_14 = arith.constant dense<0.000000e+00> : vector<16x128xf32>
    %16 = tpu.matmul %15, %11, %cst_14 {dimension_numbers = #tpu.dot_dimension_numbers<[1], [0], [0], [1], [0, 0, 1, 1], [], []>} : vector<16x128xbf16>, vector<128x128xbf16>, vector<16x128xf32> -> vector<16x128xf32>
    %17 = arith.truncf %16 : vector<16x128xf32> to vector<16x128xbf16>
    %c0_15 = arith.constant 0 : index
    %c0_16 = arith.constant 0 : index
    %18 = vector.load %arg7[%c0_15, %c0_16] : memref<128x128xbf16, #tpu.memory_space<vmem>>, vector<128x128xbf16>
    %cst_17 = arith.constant dense<0.000000e+00> : vector<16x128xf32>
    %19 = tpu.matmul %17, %18, %cst_17 {dimension_numbers = #tpu.dot_dimension_numbers<[1], [0], [0], [1], [0, 0, 1, 1], [], []>} : vector<16x128xbf16>, vector<128x128xbf16>, vector<16x128xf32> -> vector<16x128xf32>
    %c0_18 = arith.constant 0 : index
    %c0_19 = arith.constant 0 : index
    %c0_20 = arith.constant 0 : index
    %20 = vector.load %arg8[%c0_18, %c0_19, %c0_20] : memref<1x16x128xf32, #tpu.memory_space<vmem>>, vector<1x16x128xf32>
    %21 = vector.shape_cast %20 : vector<1x16x128xf32> to vector<16x128xf32>
    %22 = vector.shape_cast %19 : vector<16x128xf32> to vector<1x16x128xf32>
    tpu.vector_store %arg8[%c0_18, %c0_19, %c0_20], %22 {strides = array<i32>} : memref<1x16x128xf32, #tpu.memory_space<vmem>>, vector<1x16x128xf32>,
    return
  }
  func.func @transform_0(%arg0: i32) -> (i32, i32) {
    %c0_i32 = arith.constant 0 : i32
    %c0_i32_0 = arith.constant 0 : i32
    return %arg0, %c0_i32 : i32, i32
  }
  func.func @transform_1(%arg0: i32) -> (i32, i32) {
    %c0_i32 = arith.constant 0 : i32
    %c0_i32_0 = arith.constant 0 : i32
    return %arg0, %c0_i32 : i32, i32
  }
  func.func @transform_2(%arg0: i32) -> (i32, i32) {
    %c0_i32 = arith.constant 0 : i32
    %c0_i32_0 = arith.constant 0 : i32
    %c0_i32_1 = arith.constant 0 : i32
    return %c0_i32, %c0_i32_0 : i32, i32
  }
  func.func @transform_3(%arg0: i32) -> (i32, i32) {
    %c0_i32 = arith.constant 0 : i32
    %c0_i32_0 = arith.constant 0 : i32
    %c0_i32_1 = arith.constant 0 : i32
    return %c0_i32, %c0_i32_0 : i32, i32
  }
  func.func @transform_4(%arg0: i32) -> (i32, i32) {
    %c0_i32 = arith.constant 0 : i32
    %c0_i32_0 = arith.constant 0 : i32
    %c0_i32_1 = arith.constant 0 : i32
    return %c0_i32, %c0_i32_0 : i32, i32
  }
  func.func @transform_5(%arg0: i32) -> (i32, i32) {
    %c0_i32 = arith.constant 0 : i32
    %c0_i32_0 = arith.constant 0 : i32
    %c0_i32_1 = arith.constant 0 : i32
    return %c0_i32, %c0_i32_0 : i32, i32
  }
  func.func @transform_6(%arg0: i32) -> (i32, i32) {
    %c0_i32 = arith.constant 0 : i32
    %c0_i32_0 = arith.constant 0 : i32
    %c0_i32_1 = arith.constant 0 : i32
    return %c0_i32, %c0_i32_0 : i32, i32
  }
  func.func @transform_7(%arg0: i32) -> (i32, i32, i32) {
    %c0_i32 = arith.constant 0 : i32
    %c0_i32_0 = arith.constant 0 : i32
    %c0_i32_1 = arith.constant 0 : i32
    return %arg0, %c0_i32, %c0_i32_0 : i32, i32, i32
  }
}

</mosaic_0001>

<bundles_post_ra>
// kernel: tpu_custom_call.1
= control target key start
LH: loop header
LB: loop body
LE: loop exit
PB: predicated region body
PF: predicated region fallthrough
CT: control target
= control target key end

     0   :  { %12 = vsyncpa [#allocation3], 0  ;;  %s1176_s0 = inlined_call_operand.hbm [shape: bf16[128,128], index: 0, kind: input, shape index: {}]   ;;  %s1177_s1 = inlined_call_operand.hbm [shape: bf16[128,128], index: 1, kind: input, shape index: {}]   ;;  %s1178_s2 = inlined_call_operand.hbm [shape: bf16[128,128], index: 2, kind: input, shape index: {}]   ;;  %s1179_s3 = inlined_call_operand.hbm [shape: bf16[16,128], index: 3, kind: input, shape index: {}]   ;;  %s1180_s4 = inlined_call_operand.hbm [shape: bf16[128,128], index: 4, kind: input, shape index: {}]   ;;  %s1181_s5 = inlined_call_operand.hbm [shape: f32[8,128], index: 5, kind: input, shape index: {}]   ;;  %s1182_s6 = inlined_call_operand.hbm [shape: bf16[128,128], index: 6, kind: input, shape index: {}]   ;;  %s1183_s7 = inlined_call_operand.hbm [shape: f32[1,16,128], index: 7, kind: output, shape index: {}]  }
   0x1   :  { %13 = vsyncpa [#allocation6], 0 }
   0x2   :  { %14 = vsyncpa [#allocation9], 0 }
   0x3   :  { %15 = vsyncpa [#allocation12], 0 }
   0x4   :  { %16 = vsyncpa [#allocation4], 0  ;;  %s34_s26 = sshll.u32 %s1177_s1, 4  ;;  %s1082_s27 = smov [#allocation5]   ;;  %s35_s26 = int_to_ptr.hbm [resolvable:$true] %s34_s26 }
   0x5   :  { %s36_s28 = sshll.u32 %s1082_s27, 4  ;;  %s60_s8 = sshll.u32 %s1179_s3, 4  ;;  %s37_s28 = int_to_ptr.vmem [resolvable:$true] %s36_s28  ;;  %s61_s8 = int_to_ptr.hbm [resolvable:$true] %s60_s8 }
   0x6   :  { %s1083_s9 = smov 64   ;;  %s1084_s10 = smov 4  }
   0x7   :  { %42 = dma.hbm_to_vmem [thread:$0]  %s35_s26, 1024, %s37_s28, [#allocation6], %s1083_s9, %s1083_s9, %s1084_s10  }
   0x8   :  { %s1085_s11 = smov [#allocation8]   ;;  %s87_s1 = sshll.u32 %s1181_s5, 4  ;;  %s88_s1 = int_to_ptr.hbm [resolvable:$true] %s87_s1 }
   0x9   :  { %s62_s12 = sshll.u32 %s1085_s11, 4  ;;  %s21_s16 = sshll.u32 %s1176_s0, 4  ;;  %s63_s12 = int_to_ptr.vmem [resolvable:$true] %s62_s12  ;;  %s22_s16 = int_to_ptr.hbm [resolvable:$true] %s21_s16 }
   0xa   :  { %68 = dma.hbm_to_vmem [thread:$0]  %s61_s8, 128, %s63_s12, [#allocation9], %s1083_s9, %s1083_s9, %s1084_s10  }
   0xb   :  { %s1086_s17 = smov [#allocation11]   ;;  %s1087_s19 = smov [#allocation2]  }
   0xc   :  { %s89_s18 = sshll.u32 %s1086_s17, 4  ;;  %s23_s20 = sshll.u32 %s1087_s19, 4  ;;  %s90_s18 = int_to_ptr.vmem [resolvable:$true] %s89_s18  ;;  %s24_s20 = int_to_ptr.vmem [resolvable:$true] %s23_s20 }
   0xd   :  { %92 = dma.hbm_to_vmem [thread:$0]  %s88_s1, 128, %s90_s18, [#allocation12]  }
   0xe   :  { %s47_s5 = sshll.u32 %s1178_s2, 4  ;;  %s73_s0 = sshll.u32 %s1180_s4, 4  ;;  %s48_s5 = int_to_ptr.hbm [resolvable:$true] %s47_s5  ;;  %s74_s0 = int_to_ptr.hbm [resolvable:$true] %s73_s0 }
   0xf   :  { %29 = dma.hbm_to_vmem [thread:$0]  %s22_s16, 1024, %s24_s20, [#allocation3], %s1083_s9, %s1083_s9, %s1084_s10  }
  0x10   :  { %s1088_s25 = smov [#allocation7]   ;;  %s1089_s27 = smov [#allocation10]  }
  0x11   :  { %s49_s26 = sshll.u32 %s1088_s25, 4  ;;  %s75_s2 = sshll.u32 %s1089_s27, 4  ;;  %s50_s26 = int_to_ptr.vmem [resolvable:$true] %s49_s26  ;;  %s76_s2 = int_to_ptr.vmem [resolvable:$true] %s75_s2 }
  0x12   :  { %55 = dma.hbm_to_vmem [thread:$0]  %s48_s5, 1024, %s50_s26, [#allocation6], %s1083_s9, %s1083_s9, %s1084_s10  }
  0x13   :  { %s97_s30 = sshll.u32 %s1182_s6, 4  ;;  %s1090_s4 = smov [#allocation13]   ;;  %s98_s30 = int_to_ptr.hbm [resolvable:$true] %s97_s30 }
  0x14   :  { %81 = dma.hbm_to_vmem [thread:$0]  %s74_s0, 1024, %s76_s2, [#allocation9], %s1083_s9, %s1083_s9, %s1084_s10  }
  0x15   :  { %s99_s8 = sshll.u32 %s1090_s4, 4  ;;  %s100_s8 = int_to_ptr.vmem [resolvable:$true] %s99_s8 }
  0x16   :  { %105 = dma.hbm_to_vmem [thread:$0]  %s98_s30, 1024, %s100_s8, [#allocation12], %s1083_s9, %s1083_s9, %s1084_s10  }
  0x17   :  { %1072 = dma.done.wait [#allocation3], 1024  }
  0x18   :  { %1073 = vsyncadd [#allocation3], 4294966272 }
  0x19   :  { %1074 = dma.done.wait [#allocation6], 2048  }
  0x1a   :  { %1075 = vsyncadd [#allocation6], 4294965248 }
  0x1b   :  { %1076 = dma.done.wait [#allocation9], 1152  }
  0x1c   :  { %1077 = vsyncadd [#allocation9], 4294966144 }
  0x1d   :  { %1078 = dma.done.wait [#allocation12], 1152  }
  0x1e   :  { %1079 = vsyncadd [#allocation12], 4294966144  ;;  %v841_v0 = vld [vmem:[#allocation7 + $0x38] sm:$0xff]  ;;  %v840_v1 = vld [vmem:[#allocation7 + $0x30] sm:$0xff]  ;;  %s1091_s6 = smov [#allocation14]   ;;  %s646_s12 = sshll.u32 %s1183_s7, 4  ;;  %s647_s12 = int_to_ptr.hbm [resolvable:$true] %s646_s12 }
  0x1f   :  { %262 = vmatpush.bf16.msra.mxu0 %v841_v0  ;;  %v839_v2 = vld [vmem:[#allocation7 + $0x28] sm:$0xff]  ;;  %v838_v3 = vld [vmem:[#allocation7 + $0x20] sm:$0xff]  ;;  %v837_v4 = vld [vmem:[#allocation7 + $0x18] sm:$0xff]  ;;  %s644_s9 = sshll.u32 %s1091_s6, 4  ;;  %s1092_s13 = smov 128   ;;  %s645_s9 = int_to_ptr.vmem [resolvable:$true] %s644_s9 }
  0x20   :  { %v836_v5 = vld [vmem:[#allocation7 + $0x10] sm:$0xff]  ;;  %v835_v6 = vld [vmem:[#allocation7 + $0x8] sm:$0xff]  ;;  %v834_v7 = vld [vmem:[#allocation7] sm:$0xff]  ;;  %s1093_s14 = smov 8  }
  0x21   :  { %v826_v8 = vld [vmem:[#allocation2] sm:$0xff]  ;;  %v827_v9 = vld [vmem:[#allocation2 + $0x8] sm:$0xff]  ;;  %v828_v10 = vld [vmem:[#allocation2 + $0x10] sm:$0xff] }
  0x22   :  { %v829_v11 = vld [vmem:[#allocation2 + $0x18] sm:$0xff]  ;;  %v830_v12 = vld [vmem:[#allocation2 + $0x20] sm:$0xff]  ;;  %v831_v15 = vld [vmem:[#allocation2 + $0x28] sm:$0xff] }
  0x23   :  { %263 = vmatpush.bf16.msra.mxu0 %v840_v1  ;;  %v849_v13 = vld [vmem:[#allocation10 + $0x38] sm:$0xff]  ;;  %v848_v14 = vld [vmem:[#allocation10 + $0x30] sm:$0xff]  ;;  %v847_v16 = vld [vmem:[#allocation10 + $0x28] sm:$0xff] }
  0x24   :  { %385 = vmatpush.bf16.msra.mxu1 %v849_v13  ;;  %v846_v17 = vld [vmem:[#allocation10 + $0x20] sm:$0xff]  ;;  %v845_v18 = vld [vmem:[#allocation10 + $0x18] sm:$0xff]  ;;  %v844_v19 = vld [vmem:[#allocation10 + $0x10] sm:$0xff] }
  0x25   :  { %v832_v20 = vld [vmem:[#allocation2 + $0x30] sm:$0xff]  ;;  %v842_v22 = vld [vmem:[#allocation10] sm:$0xff]  ;;  %v833_v23 = vld [vmem:[#allocation2 + $0x38] sm:$0xff] }
  0x26   :  { %v843_v21 = vld [vmem:[#allocation10 + $0x8] sm:$0xff]  ;;  %v858_v33 = vld [vmem:[#allocation5 + $0x38] sm:$0xff]  ;;  %v856_v38 = vld [vmem:[#allocation5 + $0x28] sm:$0xff] }
  0x27   :  { %264 = vmatpush.bf16.msra.mxu0 %v839_v2  ;;  %530 = vmatpush.bf16.xpose.msra.mxu2 %v858_v33  ;;  %v857_v35 = vld [vmem:[#allocation5 + $0x30] sm:$0xff]  ;;  %v855_v40 = vld [vmem:[#allocation5 + $0x20] sm:$0xff]  ;;  %v854_v43 = vld [vmem:[#allocation5 + $0x18] sm:$0xff] }
  0x28   :  { %386 = vmatpush.bf16.msra.mxu1 %v848_v14  ;;  %v853_v45 = vld [vmem:[#allocation5 + $0x10] sm:$0xff]  ;;  %v852_v48 = vld [vmem:[#allocation5 + $0x8] sm:$0xff]  ;;  %v851_v50 = vld [vmem:[#allocation5] sm:$0xff] }
  0x29   :  { %v850_v53 = vld [vmem:[#allocation8] sm:$0xff]  ;;  %v879_v58 = vld [vmem:[#allocation11] ss:$0 sm:$0xff] }
  0x2b   :  { %265 = vmatpush.bf16.msra.mxu0 %v838_v3 }
  0x2c   :  { %387 = vmatpush.bf16.msra.mxu1 %v847_v16 }
  0x2f   :  { %266 = vmatpush.bf16.msra.mxu0 %v837_v4  ;;  %531 = vmatpush.bf16.xpose.msra.mxu2 %v857_v35 }
  0x30   :  { %388 = vmatpush.bf16.msra.mxu1 %v846_v17 }
  0x33   :  { %267 = vmatpush.bf16.msra.mxu0 %v836_v5 }
  0x34   :  { %389 = vmatpush.bf16.msra.mxu1 %v845_v18 }
  0x37   :  { %268 = vmatpush.bf16.msra.mxu0 %v835_v6  ;;  %532 = vmatpush.bf16.xpose.msra.mxu2 %v856_v38 }
  0x38   :  { %390 = vmatpush.bf16.msra.mxu1 %v844_v19 }
  0x3b   :  { %269 = vmatpush.bf16.msra.mxu0 %v834_v7 }
  0x3c   :  { %391 = vmatpush.bf16.msra.mxu1 %v843_v21 }
  0x3e   :  { %270 = vmatmul.bf16.vlgmr.msra.gmra.mxu0 %v826_v8 }
  0x3f   :  { %533 = vmatpush.bf16.xpose.msra.mxu2 %v855_v40 }
  0x40   :  { %392 = vmatpush.bf16.msra.mxu1 %v842_v22 }
  0x47   :  { %534 = vmatpush.bf16.xpose.msra.mxu2 %v854_v43 }
  0x4e   :  { %275 = vmatmul.bf16.gmra.mxu0 %v827_v9 }
  0x4f   :  { %535 = vmatpush.bf16.xpose.msra.mxu2 %v853_v45 }
  0x57   :  { %536 = vmatpush.bf16.xpose.msra.mxu2 %v852_v48 }
  0x5e   :  { %280 = vmatmul.bf16.gmra.mxu0 %v828_v10 }
  0x5f   :  { %537 = vmatpush.bf16.xpose.msra.mxu2 %v851_v50 }
  0x66   :  { %538 = vmatmul.bf16.vlgmr.msra.gmra.mxu2 %v850_v53 }
  0x6e   :  { %285 = vmatmul.bf16.gmra.mxu0 %v829_v11 }
  0x7e   :  { %290 = vmatmul.bf16.gmra.mxu0 %v830_v12 }
  0x8e   :  { %295 = vmatmul.bf16.gmra.mxu0 %v831_v15 }
  0x9e   :  { %300 = vmatmul.bf16.gmra.mxu0 %v832_v20 }
  0xae   :  { %305 = vmatmul.bf16.gmra.mxu0 %v833_v23 }
  0xbb   :  { %v271_v24 = vpop.f32.mrf.mxu0 }
  0xc3   :  { %v273_v25 = vpop.f32.mrf.mxu0 }
  0xc4   :  { %v311_v26 = vpack.c.bf16 %v273_v25, %v271_v24 }
  0xc6   :  { %393 = vmatmul.bf16.vlgmr.msra.gmra.mxu1 %v311_v26 }
  0xcb   :  { %v276_v27 = vpop.f32.mrf.mxu0 }
  0xd3   :  { %v278_v28 = vpop.f32.mrf.mxu0 }
  0xd4   :  { %v312_v29 = vpack.c.bf16 %v278_v28, %v276_v27 }
  0xd6   :  { %398 = vmatmul.bf16.gmra.mxu1 %v312_v29 }
  0xdb   :  { %v281_v30 = vpop.f32.mrf.mxu0 }
  0xe3   :  { %v283_v31 = vpop.f32.mrf.mxu0 }
  0xe4   :  { %v313_v32 = vpack.c.bf16 %v283_v31, %v281_v30 }
  0xe6   :  { %403 = vmatmul.bf16.gmra.mxu1 %v313_v32 }
  0xe9   :  { %v539_v50 = vpop.f32.mrf.mxu2 }
  0xeb   :  { %v286_v34 = vpop.f32.mrf.mxu0 }
  0xf3   :  { %v288_v36 = vpop.f32.mrf.mxu0 }
  0xf4   :  { %v314_v37 = vpack.c.bf16 %v288_v36, %v286_v34 }
  0xf6   :  { %408 = vmatmul.bf16.gmra.mxu1 %v314_v37 }
  0xfb   :  { %v291_v39 = vpop.f32.mrf.mxu0 }
 0x103   :  { %v293_v41 = vpop.f32.mrf.mxu0 }
 0x104   :  { %v315_v42 = vpack.c.bf16 %v293_v41, %v291_v39 }
 0x106   :  { %413 = vmatmul.bf16.gmra.mxu1 %v315_v42 }
 0x10b   :  { %v296_v44 = vpop.f32.mrf.mxu0 }
 0x113   :  { %v298_v46 = vpop.f32.mrf.mxu0 }
 0x114   :  { %v316_v47 = vpack.c.bf16 %v298_v46, %v296_v44 }
 0x116   :  { %418 = vmatmul.bf16.gmra.mxu1 %v316_v47 }
 0x11b   :  { %v301_v49 = vpop.f32.mrf.mxu0 }
 0x123   :  { %v303_v51 = vpop.f32.mrf.mxu0 }
 0x124   :  { %v317_v52 = vpack.c.bf16 %v303_v51, %v301_v49  ;;  %v866_v51 = vld [vmem:[#allocation13 + $0x38] sm:$0xff] }
 0x126   :  { %423 = vmatmul.bf16.gmra.mxu1 %v317_v52  ;;  %v541_v52 = vpop.f32.mrf.mxu2 }
 0x127   :  { %v544_v53 = vpack.c.bf16 %v541_v52, %v539_v50 }
 0x12b   :  { %v306_v54 = vpop.f32.mrf.mxu0 }
 0x133   :  { %v308_v55 = vpop.f32.mrf.mxu0 }
 0x134   :  { %v318_v56 = vpack.c.bf16 %v308_v55, %v306_v54  ;;  %v865_v54 = vld [vmem:[#allocation13 + $0x30] sm:$0xff]  ;;  %v864_v55 = vld [vmem:[#allocation13 + $0x28] sm:$0xff] }
 0x136   :  { %428 = vmatmul.bf16.gmra.mxu1 %v318_v56  ;;  %v863_v56 = vld [vmem:[#allocation13 + $0x20] sm:$0xff] }
 0x143   :  { %v394_v57 = vpop.f32.mrf.mxu1 }
 0x144   :  { %v395_v59 = vadd.f32 %v879_v58, %v394_v57  ;;  %v862_v57 = vld [vmem:[#allocation13 + $0x18] sm:$0xff] }
 0x146   :  { %v434_v62 = vmax.f32 %v395_v59, 0.0  ;;  %v860_v59 = vld [vmem:[#allocation13 + $0x8] sm:$0xff] }
 0x14b   :  { %v396_v60 = vpop.f32.mrf.mxu1 }
 0x14c   :  { %v397_v61 = vadd.f32 %v879_v58, %v396_v60  ;;  %v859_v60 = vld [vmem:[#allocation13] sm:$0xff] }
 0x14e   :  { %v435_v63 = vmax.f32 %v397_v61, 0.0 }
 0x150   :  { %v450_v0 = vpack.c.bf16 %v435_v63, %v434_v62 }
 0x153   :  { %v399_v1 = vpop.f32.mrf.mxu1 }
 0x154   :  { %v400_v2 = vadd.f32 %v879_v58, %v399_v1 }
 0x156   :  { %v436_v5 = vmax.f32 %v400_v2, 0.0 }
 0x15b   :  { %v401_v3 = vpop.f32.mrf.mxu1 }
 0x15c   :  { %v402_v4 = vadd.f32 %v879_v58, %v401_v3 }
 0x15e   :  { %v437_v6 = vmax.f32 %v402_v4, 0.0 }
 0x160   :  { %v451_v7 = vpack.c.bf16 %v437_v6, %v436_v5 }
 0x163   :  { %v404_v8 = vpop.f32.mrf.mxu1 }
 0x164   :  { %v405_v9 = vadd.f32 %v879_v58, %v404_v8 }
 0x166   :  { %v438_v12 = vmax.f32 %v405_v9, 0.0 }
 0x16b   :  { %v406_v10 = vpop.f32.mrf.mxu1 }
 0x16c   :  { %v407_v11 = vadd.f32 %v879_v58, %v406_v10 }
 0x16e   :  { %v439_v13 = vmax.f32 %v407_v11, 0.0 }
 0x170   :  { %v452_v14 = vpack.c.bf16 %v439_v13, %v438_v12 }
 0x173   :  { %v409_v15 = vpop.f32.mrf.mxu1 }
 0x174   :  { %v410_v16 = vadd.f32 %v879_v58, %v409_v15 }
 0x176   :  { %v440_v19 = vmax.f32 %v410_v16, 0.0 }
 0x17b   :  { %v411_v17 = vpop.f32.mrf.mxu1 }
 0x17c   :  { %v412_v18 = vadd.f32 %v879_v58, %v411_v17 }
 0x17e   :  { %v441_v20 = vmax.f32 %v412_v18, 0.0 }
 0x180   :  { %v453_v21 = vpack.c.bf16 %v441_v20, %v440_v19 }
 0x183   :  { %v414_v22 = vpop.f32.mrf.mxu1 }
 0x184   :  { %v415_v44 = vadd.f32 %v879_v58, %v414_v22 }
 0x186   :  { %v442_v48 = vmax.f32 %v415_v44, 0.0 }
 0x18b   :  { %v416_v23 = vpop.f32.mrf.mxu1 }
 0x18c   :  { %v417_v41 = vadd.f32 %v879_v58, %v416_v23 }
 0x18e   :  { %v443_v46 = vmax.f32 %v417_v41, 0.0 }
 0x190   :  { %v454_v49 = vpack.c.bf16 %v443_v46, %v442_v48 }
 0x193   :  { %v419_v24 = vpop.f32.mrf.mxu1 }
 0x194   :  { %v420_v39 = vadd.f32 %v879_v58, %v419_v24 }
 0x196   :  { %v444_v45 = vmax.f32 %v420_v39, 0.0 }
 0x19b   :  { %v421_v25 = vpop.f32.mrf.mxu1 }
 0x19c   :  { %v422_v36 = vadd.f32 %v879_v58, %v421_v25 }
 0x19e   :  { %v445_v42 = vmax.f32 %v422_v36, 0.0 }
 0x1a0   :  { %v455_v47 = vpack.c.bf16 %v445_v42, %v444_v45 }
 0x1a3   :  { %v424_v26 = vpop.f32.mrf.mxu1 }
 0x1a4   :  { %v425_v33 = vadd.f32 %v879_v58, %v424_v26 }
 0x1a6   :  { %v446_v40 = vmax.f32 %v425_v33, 0.0 }
 0x1ab   :  { %v426_v27 = vpop.f32.mrf.mxu1 }
 0x1ac   :  { %v427_v31 = vadd.f32 %v879_v58, %v426_v27 }
 0x1ae   :  { %v447_v37 = vmax.f32 %v427_v31, 0.0 }
 0x1b0   :  { %v456_v43 = vpack.c.bf16 %v447_v37, %v446_v40 }
 0x1b3   :  { %v429_v28 = vpop.f32.mrf.mxu1 }
 0x1b4   :  { %v430_v29 = vadd.f32 %v879_v58, %v429_v28 }
 0x1b6   :  { %v448_v34 = vmax.f32 %v430_v29, 0.0 }
 0x1bb   :  { %v431_v30 = vpop.f32.mrf.mxu1 }
 0x1bc   :  { %v432_v32 = vadd.f32 %v879_v58, %v431_v30  ;;  %v861_v58 = vld [vmem:[#allocation13 + $0x10] sm:$0xff] }
 0x1be   :  { %v449_v35 = vmax.f32 %v432_v32, 0.0 }
 0x1c0   :  { %v457_v38 = vpack.c.bf16 %v449_v35, %v448_v34 }
 0x1c2   :  { %545 = vmatpush.bf16.msra.mxu3 %v457_v38 }
 0x1c6   :  { %546 = vmatpush.bf16.msra.mxu3 %v456_v43 }
 0x1ca   :  { %547 = vmatpush.bf16.msra.mxu3 %v455_v47 }
 0x1ce   :  { %548 = vmatpush.bf16.msra.mxu3 %v454_v49 }
 0x1d2   :  { %549 = vmatpush.bf16.msra.mxu3 %v453_v21 }
 0x1d6   :  { %550 = vmatpush.bf16.msra.mxu3 %v452_v14 }
 0x1da   :  { %551 = vmatpush.bf16.msra.mxu3 %v451_v7 }
 0x1de   :  { %552 = vmatpush.bf16.msra.mxu3 %v450_v0 }
 0x1e1   :  { %553 = vmatmul.bf16.vlgmr.msra.gmra.mxu3 %v544_v53 }
 0x1e2   :  { %624 = vmatpush.bf16.msrb.mxu3 %v866_v51 }
 0x1e6   :  { %625 = vmatpush.bf16.msrb.mxu3 %v865_v54 }
 0x1ea   :  { %626 = vmatpush.bf16.msrb.mxu3 %v864_v55 }
 0x1ee   :  { %627 = vmatpush.bf16.msrb.mxu3 %v863_v56 }
 0x1f2   :  { %628 = vmatpush.bf16.msrb.mxu3 %v862_v57 }
 0x1f6   :  { %629 = vmatpush.bf16.msrb.mxu3 %v861_v58 }
 0x1fa   :  { %630 = vmatpush.bf16.msrb.mxu3 %v860_v59 }
 0x1fe   :  { %631 = vmatpush.bf16.msrb.mxu3 %v859_v60 }
 0x264   :  { %v554_v61 = vpop.f32.mrf.mxu3 }
 0x26c   :  { %v556_v62 = vpop.f32.mrf.mxu3 }
 0x26d   :  { %v559_v63 = vpack.c.bf16 %v556_v62, %v554_v61 }
 0x26f   :  { %632 = vmatmul.bf16.vlgmr.msrb.gmra.mxu3 %v559_v63 }
 0x2f2   :  { %v633_v0 = vpop.f32.mrf.mxu3 }
 0x2f3   :  { %638 = vst [vmem:[#allocation14] sm:$0xff] %v633_v0 }
 0x2fa   :  { %v635_v1 = vpop.f32.mrf.mxu3 }
 0x2fb   :  { %639 = vst [vmem:[#allocation14 + $0x8] sm:$0xff] %v635_v1 }
 0x2fc   :  { %652 = dma.vmem_to_hbm [thread:$0]  %s645_s9, 256, %s647_s12, [#allocation4], %s1092_s13, %s1092_s13, %s1093_s14  }
 0x2fd   :  { %1080 = dma.done.wait [#allocation4], 256  }
 0x2fe   :  { %1081 = vsyncadd [#allocation4], 4294967040 }
 0x2ff   :  { %657 = vsyncpa [#allocation3], 1 }
 0x300   :  { %658 = vsyncpa [#allocation6], 1 }
 0x301   :  { %659 = vsyncpa [#allocation9], 1 }
 0x302   :  { %660 = vsyncpa [#allocation12], 1 }
 0x303   :  { %661 = vsyncpa [#allocation4], 1 }

</bundles_post_ra>
